<compile_context>
chip_gen: v6e
topology: v6e:2x2x1
jax: 0.10.0
libtpu: 0.0.40
codegen_flags: <defaults>
</compile_context>

<pallas_src>
import math
import functools

import jax
import jax.numpy as jnp
from jax import lax
from jax.experimental import pallas as pl
from jax.experimental.pallas import tpu as pltpu


# ----------------------------- kernels ------------------------------------


def _qkv_proj_kernel(x_ref, wq_ref, wk_ref, wv_ref, bq_ref, bk_ref, bv_ref,
                     q_ref, k_ref, v_ref, *, scale):
    """Project one (tile, D) slab of x into scaled-Q, K, V (bf16 outputs)."""
    x = x_ref[0]                                               # (t, D) bf16
    q = jnp.dot(x, wq_ref[...], preferred_element_type=jnp.float32) + bq_ref[...]
    k = jnp.dot(x, wk_ref[...], preferred_element_type=jnp.float32) + bk_ref[...]
    v = jnp.dot(x, wv_ref[...], preferred_element_type=jnp.float32) + bv_ref[...]
    # Fold 1/sqrt(D) into Q here (O(S*D)) so the (tq, tk) score tile is never
    # touched by an elementwise scale.
    q_ref[0] = (q * scale).astype(q_ref.dtype)
    k_ref[0] = k.astype(k_ref.dtype)
    v_ref[0] = v.astype(v_ref.dtype)


def _flash_attn_kernel(q_ref, k_ref, v_ref, o_ref, m_sc, l_sc, acc_sc,
                       *, kv_tile, seq_len, need_mask):
    """Online-softmax attention over kv tiles; q/k/v bf16, stats/acc f32."""
    ki = pl.program_id(2)

    @pl.when(ki == 0)
    def _init():
        m_sc[...] = jnp.full_like(m_sc, -jnp.inf)
        l_sc[...] = jnp.zeros_like(l_sc)
        acc_sc[...] = jnp.zeros_like(acc_sc)

    q = q_ref[0]                                               # (tq, D) bf16
    k = k_ref[0]                                               # (tk, D) bf16
    v = v_ref[0]                                               # (tk, D) bf16

    # Scores: contract the last dims directly (transpose absorbed by the MXU).
    s = lax.dot_general(q, k, (((1,), (1,)), ((), ())),
                        preferred_element_type=jnp.float32)    # (tq, tk) f32

    if need_mask:
        # Mask keys that are zero-padding past the true sequence length.
        kv_idx = ki * kv_tile + lax.broadcasted_iota(jnp.int32, s.shape, 1)
        s = jnp.where(kv_idx < seq_len, s, -jnp.inf)

    # Online-softmax update (f32 stats; exp on the EUP).
    m_prev = m_sc[...]
    m_new = jnp.maximum(m_prev, jnp.max(s, axis=-1, keepdims=True))
    alpha = jnp.exp(m_prev - m_new)
    p = jnp.exp(s - m_new)                                     # (tq, tk) f32
    l_sc[...] = alpha * l_sc[...] + jnp.sum(p, axis=-1, keepdims=True)
    acc_sc[...] = alpha * acc_sc[...] + jnp.dot(
        p.astype(v.dtype), v, preferred_element_type=jnp.float32)
    m_sc[...] = m_new

    @pl.when(ki == pl.num_programs(2) - 1)
    def _finalize():
        # Exact divide: runs once per (batch, q-tile), so cost is negligible.
        o_ref[0] = (acc_sc[...] / l_sc[...]).astype(o_ref.dtype)


# ----------------------------- wrapper -------------------------------------


def _round_up(x, m):
    return ((x + m - 1) // m) * m


def _pick_tile(seq_len, preferred):
    preferred = _round_up(preferred, 8)
    if seq_len <= preferred:
        return _round_up(seq_len, 8)   # whole (padded) sequence in one tile
    return preferred                    # padding + key mask handles ragged S


@functools.partial(jax.jit, static_argnames=("tile",))
def self_att_v2(x, w_qkv_t, b_qkv, *, tile=256):
    """x: (B, S, D); w_qkv_t: (D, 3D) (= W^T of nn.Linear); b_qkv: (3D,)."""
    B, S, D = x.shape
    out_dtype = x.dtype

    t = _pick_tile(S, tile)
    s_pad = _round_up(S, t)
    need_mask = s_pad != S
    n_tiles = s_pad // t

    # Wrapper-side prep (one-time XLA ops): split fused QKV weights, cast MXU
    # operands to bf16, zero-pad S up to a tile multiple.
    wq = w_qkv_t[:, 0 * D:1 * D].astype(jnp.bfloat16)
    wk = w_qkv_t[:, 1 * D:2 * D].astype(jnp.bfloat16)
    wv = w_qkv_t[:, 2 * D:3 * D].astype(jnp.bfloat16)
    bq = b_qkv[0 * D:1 * D].reshape(1, D).astype(jnp.float32)
    bk = b_qkv[1 * D:2 * D].reshape(1, D).astype(jnp.float32)
    bv = b_qkv[2 * D:3 * D].reshape(1, D).astype(jnp.float32)

    x_b = x.astype(jnp.bfloat16)
    if need_mask:
        x_b = jnp.pad(x_b, ((0, 0), (0, s_pad - S), (0, 0)))

    bpe = 2  # bf16 bytes
    mib = 1024 * 1024

    # ---- Pass 1: QKV projection (each of Q/K/V computed exactly once). ----
    proj_vmem = (2 * t * D * bpe            # x tile (double-buffered)
                 + 3 * 2 * D * D * bpe      # Wq/Wk/Wv (double-buffered)
                 + 3 * 2 * t * D * bpe      # q/k/v out tiles
                 + 3 * t * D * 4)           # f32 matmul results
    proj_limit = int(min(48 * mib, max(32 * mib, 2 * proj_vmem)))

    qkv_shape = jax.ShapeDtypeStruct((B, s_pad, D), jnp.bfloat16)
    q_s, k_s, v_s = pl.pallas_call(
        functools.partial(_qkv_proj_kernel, scale=1.0 / math.sqrt(D)),
        out_shape=(qkv_shape, qkv_shape, qkv_shape),
        grid_spec=pltpu.PrefetchScalarGridSpec(
            num_scalar_prefetch=0,
            grid=(B, n_tiles),
            in_specs=[
                pl.BlockSpec((1, t, D), lambda b, i: (b, i, 0)),   # x
                pl.BlockSpec((D, D), lambda b, i: (0, 0)),         # Wq
                pl.BlockSpec((D, D), lambda b, i: (0, 0)),         # Wk
                pl.BlockSpec((D, D), lambda b, i: (0, 0)),         # Wv
                pl.BlockSpec((1, D), lambda b, i: (0, 0)),         # bq
                pl.BlockSpec((1, D), lambda b, i: (0, 0)),         # bk
                pl.BlockSpec((1, D), lambda b, i: (0, 0)),         # bv
            ],
            out_specs=[
                pl.BlockSpec((1, t, D), lambda b, i: (b, i, 0)),   # Q (scaled)
                pl.BlockSpec((1, t, D), lambda b, i: (b, i, 0)),   # K
                pl.BlockSpec((1, t, D), lambda b, i: (b, i, 0)),   # V
            ],
        ),
        compiler_params=pltpu.CompilerParams(
            dimension_semantics=("parallel", "parallel"),
            vmem_limit_bytes=proj_limit,
        ),
    )(x_b, wq, wk, wv, bq, bk, bv)

    # ---- Pass 2: flash attention over (batch, q-tiles, kv-tiles). ----
    flash_vmem = (3 * 2 * t * D * bpe       # q/k/v in tiles (double-buffered)
                  + 2 * t * D * 4           # output tile (f32, double-buffered)
                  + t * D * 4 + 2 * t * 4   # acc / m / l scratch
                  + 2 * t * t * 4)          # s and p intermediates
    flash_limit = int(min(48 * mib, max(32 * mib, 2 * flash_vmem)))

    out = pl.pallas_call(
        functools.partial(_flash_attn_kernel, kv_tile=t, seq_len=S,
                          need_mask=need_mask),
        out_shape=jax.ShapeDtypeStruct((B, s_pad, D), out_dtype),
        grid_spec=pltpu.PrefetchScalarGridSpec(
            num_scalar_prefetch=0,
            grid=(B, n_tiles, n_tiles),
            in_specs=[
                pl.BlockSpec((1, t, D), lambda b, qi, ki: (b, qi, 0)),  # Q
                pl.BlockSpec((1, t, D), lambda b, qi, ki: (b, ki, 0)),  # K
                pl.BlockSpec((1, t, D), lambda b, qi, ki: (b, ki, 0)),  # V
            ],
            out_specs=pl.BlockSpec((1, t, D), lambda b, qi, ki: (b, qi, 0)),
            scratch_shapes=[
                pltpu.VMEM((t, 1), jnp.float32),   # running max m
                pltpu.VMEM((t, 1), jnp.float32),   # running sum l
                pltpu.VMEM((t, D), jnp.float32),   # output accumulator
            ],
        ),
        compiler_params=pltpu.CompilerParams(
            # batch & q-tile axes feed both v7x TensorCores; kv is the reduction.
            dimension_semantics=("parallel", "parallel", "arbitrary"),
            vmem_limit_bytes=flash_limit,
        ),
    )(q_s, k_s, v_s)

    if need_mask:
        out = out[:, :S, :]
    return out


# ----------------------------- reference / test ----------------------------


def _reference(x, w_qkv_t, b_qkv):
    """Plain-JAX f32 reference mirroring the PyTorch forward."""
    D = x.shape[-1]
    qkv = jnp.einsum("bsd,de->bse", x, w_qkv_t) + b_qkv
    q, k, v = qkv[..., :D], qkv[..., D:2 * D], qkv[..., 2 * D:]
    scores = jnp.einsum("bqd,bkd->bqk", q, k) / math.sqrt(D)
    attn = jax.nn.softmax(scores, axis=-1)
    return jnp.einsum("bqk,bkd->bqd", attn, v)


def _make_inputs(key, B, S, D):
    kx, kw, kb = jax.random.split(key, 3)
    x = jax.random.normal(kx, (B, S, D), dtype=jnp.float32)
    # nn.Linear(hidden, 3*hidden): weight (3D, D), bias (3D,). We pass W^T.
    w_qkv = jax.random.normal(kw, (3 * D, D), dtype=jnp.float32) * (1.0 / math.sqrt(D))
    b_qkv = jax.random.normal(kb, (3 * D,), dtype=jnp.float32) * 0.01
    return x, w_qkv.T, b_qkv


if __name__ == "__main__":
    # Tolerances are 2e-2 because matmul operands are bf16 (f32 accumulation);
    # the f32 reference is the PyTorch-equivalent forward.
    TOL = dict(atol=2e-2, rtol=2e-2)

    # Small shape matching the module spec (batch=2, seq=8, hidden=32).
    B, S, D = 2, 8, 32
    x, w_t, b = _make_inputs(jax.random.PRNGKey(0), B, S, D)
    out = jax.block_until_ready(self_att_v2(x, w_t, b))
    ref = _reference(x, w_t, b)
    assert out.shape == (B, S, D)
    assert jnp.allclose(out, ref, **TOL), "mismatch (small shape)"

    # Larger shape exercising the multi-step online-softmax path:
    # grid = (2, 2, 2) with 128-wide q/kv tiles.
    B2, S2, D2 = 2, 256, 128
    x2, w2_t, b2 = _make_inputs(jax.random.PRNGKey(1), B2, S2, D2)
    out2 = jax.block_until_ready(self_att_v2(x2, w2_t, b2, tile=128))
    ref2 = _reference(x2, w2_t, b2)
    assert out2.shape == (B2, S2, D2)
    assert jnp.allclose(out2, ref2, **TOL), "mismatch (tiled shape)"

    # Ragged sequence length exercising the padding + key-mask path
    # (S=200 padded to 256, last kv tile partially masked).
    B3, S3, D3 = 2, 200, 64
    x3, w3_t, b3 = _make_inputs(jax.random.PRNGKey(2), B3, S3, D3)
    out3 = jax.block_until_ready(self_att_v2(x3, w3_t, b3, tile=128))
    ref3 = _reference(x3, w3_t, b3)
    assert out3.shape == (B3, S3, D3)
    assert jnp.allclose(out3, ref3, **TOL), "mismatch (ragged shape)"

    print("KERNEL_OK")
</pallas_src>

<mosaic_0001>
module attributes {stable_mosaic.version = 11 : i64} {
  func.func @_qkv_proj_kernel(%arg0: i32, %arg1: i32, %arg2: memref<1x8x32xbf16, #tpu.memory_space<vmem>>, %arg3: memref<32x32xbf16, #tpu.memory_space<vmem>>, %arg4: memref<32x32xbf16, #tpu.memory_space<vmem>>, %arg5: memref<32x32xbf16, #tpu.memory_space<vmem>>, %arg6: memref<1x32xf32, #tpu.memory_space<vmem>>, %arg7: memref<1x32xf32, #tpu.memory_space<vmem>>, %arg8: memref<1x32xf32, #tpu.memory_space<vmem>>, %arg9: memref<1x8x32xbf16, #tpu.memory_space<vmem>>, %arg10: memref<1x8x32xbf16, #tpu.memory_space<vmem>>, %arg11: memref<1x8x32xbf16, #tpu.memory_space<vmem>>) attributes {dimension_semantics = [#tpu.dimension_semantics<parallel>, #tpu.dimension_semantics<parallel>], iteration_bounds = array<i64: 2, 1>, scalar_prefetch = 0 : i64, scratch_operands = 0 : i64, tpu.core_type = #tpu.core_type<tc>, window_params = [{transform_indices = @transform_0, window_bounds = array<i64: 1, 8, 32>}, {pipeline_mode = #tpu.pipeline_mode<synchronous>, transform_indices = @transform_1, window_bounds = array<i64: 32, 32>}, {pipeline_mode = #tpu.pipeline_mode<synchronous>, transform_indices = @transform_2, window_bounds = array<i64: 32, 32>}, {pipeline_mode = #tpu.pipeline_mode<synchronous>, transform_indices = @transform_3, window_bounds = array<i64: 32, 32>}, {pipeline_mode = #tpu.pipeline_mode<synchronous>, transform_indices = @transform_4, window_bounds = array<i64: 1, 32>}, {pipeline_mode = #tpu.pipeline_mode<synchronous>, transform_indices = @transform_5, window_bounds = array<i64: 1, 32>}, {pipeline_mode = #tpu.pipeline_mode<synchronous>, transform_indices = @transform_6, window_bounds = array<i64: 1, 32>}, {transform_indices = @transform_7, window_bounds = array<i64: 1, 8, 32>}, {transform_indices = @transform_8, window_bounds = array<i64: 1, 8, 32>}, {transform_indices = @transform_9, window_bounds = array<i64: 1, 8, 32>}]} {
    %c0 = arith.constant 0 : index
    %c0_0 = arith.constant 0 : index
    %c0_1 = arith.constant 0 : index
    %0 = vector.load %arg2[%c0, %c0_0, %c0_1] : memref<1x8x32xbf16, #tpu.memory_space<vmem>>, vector<1x8x32xbf16>
    %1 = vector.shape_cast %0 : vector<1x8x32xbf16> to vector<8x32xbf16>
    %c0_2 = arith.constant 0 : index
    %c0_3 = arith.constant 0 : index
    %2 = vector.load %arg3[%c0_2, %c0_3] : memref<32x32xbf16, #tpu.memory_space<vmem>>, vector<32x32xbf16>
    %cst = arith.constant dense<0.000000e+00> : vector<8x32xf32>
    %3 = tpu.matmul %1, %2, %cst {dimension_numbers = #tpu.dot_dimension_numbers<[1], [0], [0], [1], [0, 0, 1, 1], [], []>} : vector<8x32xbf16>, vector<32x32xbf16>, vector<8x32xf32> -> vector<8x32xf32>
    %c0_4 = arith.constant 0 : index
    %c0_5 = arith.constant 0 : index
    %4 = vector.load %arg6[%c0_4, %c0_5] : memref<1x32xf32, #tpu.memory_space<vmem>>, vector<1x32xf32>
    %5 = vector.broadcast %4 : vector<1x32xf32> to vector<8x32xf32>
    %6 = arith.addf %3, %5 : vector<8x32xf32>
    %c0_6 = arith.constant 0 : index
    %c0_7 = arith.constant 0 : index
    %7 = vector.load %arg4[%c0_6, %c0_7] : memref<32x32xbf16, #tpu.memory_space<vmem>>, vector<32x32xbf16>
    %cst_8 = arith.constant dense<0.000000e+00> : vector<8x32xf32>
    %8 = tpu.matmul %1, %7, %cst_8 {dimension_numbers = #tpu.dot_dimension_numbers<[1], [0], [0], [1], [0, 0, 1, 1], [], []>} : vector<8x32xbf16>, vector<32x32xbf16>, vector<8x32xf32> -> vector<8x32xf32>
    %c0_9 = arith.constant 0 : index
    %c0_10 = arith.constant 0 : index
    %9 = vector.load %arg7[%c0_9, %c0_10] : memref<1x32xf32, #tpu.memory_space<vmem>>, vector<1x32xf32>
    %10 = vector.broadcast %9 : vector<1x32xf32> to vector<8x32xf32>
    %11 = arith.addf %8, %10 : vector<8x32xf32>
    %c0_11 = arith.constant 0 : index
    %c0_12 = arith.constant 0 : index
    %12 = vector.load %arg5[%c0_11, %c0_12] : memref<32x32xbf16, #tpu.memory_space<vmem>>, vector<32x32xbf16>
    %cst_13 = arith.constant dense<0.000000e+00> : vector<8x32xf32>
    %13 = tpu.matmul %1, %12, %cst_13 {dimension_numbers = #tpu.dot_dimension_numbers<[1], [0], [0], [1], [0, 0, 1, 1], [], []>} : vector<8x32xbf16>, vector<32x32xbf16>, vector<8x32xf32> -> vector<8x32xf32>
    %c0_14 = arith.constant 0 : index
    %c0_15 = arith.constant 0 : index
    %14 = vector.load %arg8[%c0_14, %c0_15] : memref<1x32xf32, #tpu.memory_space<vmem>>, vector<1x32xf32>
    %15 = vector.broadcast %14 : vector<1x32xf32> to vector<8x32xf32>
    %16 = arith.addf %13, %15 : vector<8x32xf32>
    %cst_16 = arith.constant 0.176776692 : f32
    %17 = vector.broadcast %cst_16 : f32 to vector<8x32xf32>
    %18 = arith.mulf %6, %17 : vector<8x32xf32>
    %19 = arith.truncf %18 : vector<8x32xf32> to vector<8x32xbf16>
    %c0_17 = arith.constant 0 : index
    %c0_18 = arith.constant 0 : index
    %c0_19 = arith.constant 0 : index
    %20 = vector.load %arg9[%c0_17, %c0_18, %c0_19] : memref<1x8x32xbf16, #tpu.memory_space<vmem>>, vector<1x8x32xbf16>
    %21 = vector.shape_cast %20 : vector<1x8x32xbf16> to vector<8x32xbf16>
    %22 = vector.shape_cast %19 : vector<8x32xbf16> to vector<1x8x32xbf16>
    tpu.vector_store %arg9[%c0_17, %c0_18, %c0_19], %22 {strides = array<i32>} : memref<1x8x32xbf16, #tpu.memory_space<vmem>>, vector<1x8x32xbf16>,
    %23 = arith.truncf %11 : vector<8x32xf32> to vector<8x32xbf16>
    %c0_20 = arith.constant 0 : index
    %c0_21 = arith.constant 0 : index
    %c0_22 = arith.constant 0 : index
    %24 = vector.load %arg10[%c0_20, %c0_21, %c0_22] : memref<1x8x32xbf16, #tpu.memory_space<vmem>>, vector<1x8x32xbf16>
    %25 = vector.shape_cast %24 : vector<1x8x32xbf16> to vector<8x32xbf16>
    %26 = vector.shape_cast %23 : vector<8x32xbf16> to vector<1x8x32xbf16>
    tpu.vector_store %arg10[%c0_20, %c0_21, %c0_22], %26 {strides = array<i32>} : memref<1x8x32xbf16, #tpu.memory_space<vmem>>, vector<1x8x32xbf16>,
    %27 = arith.truncf %16 : vector<8x32xf32> to vector<8x32xbf16>
    %c0_23 = arith.constant 0 : index
    %c0_24 = arith.constant 0 : index
    %c0_25 = arith.constant 0 : index
    %28 = vector.load %arg11[%c0_23, %c0_24, %c0_25] : memref<1x8x32xbf16, #tpu.memory_space<vmem>>, vector<1x8x32xbf16>
    %29 = vector.shape_cast %28 : vector<1x8x32xbf16> to vector<8x32xbf16>
    %30 = vector.shape_cast %27 : vector<8x32xbf16> to vector<1x8x32xbf16>
    tpu.vector_store %arg11[%c0_23, %c0_24, %c0_25], %30 {strides = array<i32>} : memref<1x8x32xbf16, #tpu.memory_space<vmem>>, vector<1x8x32xbf16>,
    return
  }
  func.func @transform_0(%arg0: i32, %arg1: i32) -> (i32, i32, i32) {
    %c0_i32 = arith.constant 0 : i32
    %c0_i32_0 = arith.constant 0 : i32
    return %arg0, %arg1, %c0_i32 : i32, i32, i32
  }
  func.func @transform_1(%arg0: i32, %arg1: i32) -> (i32, i32) {
    %c0_i32 = arith.constant 0 : i32
    %c0_i32_0 = arith.constant 0 : i32
    %c0_i32_1 = arith.constant 0 : i32
    return %c0_i32, %c0_i32_0 : i32, i32
  }
  func.func @transform_2(%arg0: i32, %arg1: i32) -> (i32, i32) {
    %c0_i32 = arith.constant 0 : i32
    %c0_i32_0 = arith.constant 0 : i32
    %c0_i32_1 = arith.constant 0 : i32
    return %c0_i32, %c0_i32_0 : i32, i32
  }
  func.func @transform_3(%arg0: i32, %arg1: i32) -> (i32, i32) {
    %c0_i32 = arith.constant 0 : i32
    %c0_i32_0 = arith.constant 0 : i32
    %c0_i32_1 = arith.constant 0 : i32
    return %c0_i32, %c0_i32_0 : i32, i32
  }
  func.func @transform_4(%arg0: i32, %arg1: i32) -> (i32, i32) {
    %c0_i32 = arith.constant 0 : i32
    %c0_i32_0 = arith.constant 0 : i32
    %c0_i32_1 = arith.constant 0 : i32
    return %c0_i32, %c0_i32_0 : i32, i32
  }
  func.func @transform_5(%arg0: i32, %arg1: i32) -> (i32, i32) {
    %c0_i32 = arith.constant 0 : i32
    %c0_i32_0 = arith.constant 0 : i32
    %c0_i32_1 = arith.constant 0 : i32
    return %c0_i32, %c0_i32_0 : i32, i32
  }
  func.func @transform_6(%arg0: i32, %arg1: i32) -> (i32, i32) {
    %c0_i32 = arith.constant 0 : i32
    %c0_i32_0 = arith.constant 0 : i32
    %c0_i32_1 = arith.constant 0 : i32
    return %c0_i32, %c0_i32_0 : i32, i32
  }
  func.func @transform_7(%arg0: i32, %arg1: i32) -> (i32, i32, i32) {
    %c0_i32 = arith.constant 0 : i32
    %c0_i32_0 = arith.constant 0 : i32
    return %arg0, %arg1, %c0_i32 : i32, i32, i32
  }
  func.func @transform_8(%arg0: i32, %arg1: i32) -> (i32, i32, i32) {
    %c0_i32 = arith.constant 0 : i32
    %c0_i32_0 = arith.constant 0 : i32
    return %arg0, %arg1, %c0_i32 : i32, i32, i32
  }
  func.func @transform_9(%arg0: i32, %arg1: i32) -> (i32, i32, i32) {
    %c0_i32 = arith.constant 0 : i32
    %c0_i32_0 = arith.constant 0 : i32
    return %arg0, %arg1, %c0_i32 : i32, i32, i32
  }
}

module attributes {stable_mosaic.version = 11 : i64} {
  func.func @_flash_attn_kernel(%arg0: i32, %arg1: i32, %arg2: i32, %arg3: memref<1x8x32xbf16, #tpu.memory_space<vmem>>, %arg4: memref<1x8x32xbf16, #tpu.memory_space<vmem>>, %arg5: memref<1x8x32xbf16, #tpu.memory_space<vmem>>, %arg6: memref<1x8x32xf32, #tpu.memory_space<vmem>>, %arg7: memref<8x1xf32, #tpu.memory_space<vmem>>, %arg8: memref<8x1xf32, #tpu.memory_space<vmem>>, %arg9: memref<8x32xf32, #tpu.memory_space<vmem>>) attributes {dimension_semantics = [#tpu.dimension_semantics<parallel>, #tpu.dimension_semantics<parallel>, #tpu.dimension_semantics<arbitrary>], iteration_bounds = array<i64: 2, 1, 1>, scalar_prefetch = 0 : i64, scratch_operands = 3 : i64, tpu.core_type = #tpu.core_type<tc>, window_params = [{transform_indices = @transform_0, window_bounds = array<i64: 1, 8, 32>}, {transform_indices = @transform_1, window_bounds = array<i64: 1, 8, 32>}, {transform_indices = @transform_2, window_bounds = array<i64: 1, 8, 32>}, {transform_indices = @transform_3, window_bounds = array<i64: 1, 8, 32>}]} {
    %c0_i32 = arith.constant 0 : i32
    %0 = arith.cmpi eq, %arg2, %c0_i32 : i32
    %1 = arith.extui %0 : i1 to i32
    %c0_i32_0 = arith.constant 0 : i32
    %2 = arith.cmpi ne, %1, %c0_i32_0 : i32
    scf.if %2 {
      %cst_26 = arith.constant 0xFF800000 : f32
      %36 = vector.broadcast %cst_26 : f32 to vector<8x1xf32>
      %c0_27 = arith.constant 0 : index
      %c0_28 = arith.constant 0 : index
      %37 = vector.load %arg7[%c0_27, %c0_28] : memref<8x1xf32, #tpu.memory_space<vmem>>, vector<8x1xf32>
      tpu.vector_store %arg7[%c0_27, %c0_28], %36 {strides = array<i32>} : memref<8x1xf32, #tpu.memory_space<vmem>>, vector<8x1xf32>,
      %cst_29 = arith.constant 0.000000e+00 : f32
      %38 = vector.broadcast %cst_29 : f32 to vector<8x1xf32>
      %c0_30 = arith.constant 0 : index
      %c0_31 = arith.constant 0 : index
      %39 = vector.load %arg8[%c0_30, %c0_31] : memref<8x1xf32, #tpu.memory_space<vmem>>, vector<8x1xf32>
      tpu.vector_store %arg8[%c0_30, %c0_31], %38 {strides = array<i32>} : memref<8x1xf32, #tpu.memory_space<vmem>>, vector<8x1xf32>,
      %cst_32 = arith.constant 0.000000e+00 : f32
      %40 = vector.broadcast %cst_32 : f32 to vector<8x32xf32>
      %c0_33 = arith.constant 0 : index
      %c0_34 = arith.constant 0 : index
      %41 = vector.load %arg9[%c0_33, %c0_34] : memref<8x32xf32, #tpu.memory_space<vmem>>, vector<8x32xf32>
      tpu.vector_store %arg9[%c0_33, %c0_34], %40 {strides = array<i32>} : memref<8x32xf32, #tpu.memory_space<vmem>>, vector<8x32xf32>,
    } else {
    }
    %c0 = arith.constant 0 : index
    %c0_1 = arith.constant 0 : index
    %c0_2 = arith.constant 0 : index
    %3 = vector.load %arg3[%c0, %c0_1, %c0_2] : memref<1x8x32xbf16, #tpu.memory_space<vmem>>, vector<1x8x32xbf16>
    %4 = vector.shape_cast %3 : vector<1x8x32xbf16> to vector<8x32xbf16>
    %c0_3 = arith.constant 0 : index
    %c0_4 = arith.constant 0 : index
    %c0_5 = arith.constant 0 : index
    %5 = vector.load %arg4[%c0_3, %c0_4, %c0_5] : memref<1x8x32xbf16, #tpu.memory_space<vmem>>, vector<1x8x32xbf16>
    %6 = vector.shape_cast %5 : vector<1x8x32xbf16> to vector<8x32xbf16>
    %c0_6 = arith.constant 0 : index
    %c0_7 = arith.constant 0 : index
    %c0_8 = arith.constant 0 : index
    %7 = vector.load %arg5[%c0_6, %c0_7, %c0_8] : memref<1x8x32xbf16, #tpu.memory_space<vmem>>, vector<1x8x32xbf16>
    %8 = vector.shape_cast %7 : vector<1x8x32xbf16> to vector<8x32xbf16>
    %cst = arith.constant dense<0.000000e+00> : vector<8x8xf32>
    %9 = tpu.matmul %4, %6, %cst {dimension_numbers = #tpu.dot_dimension_numbers<[1], [1], [0], [0], [0, 0, 1, 0], [], []>} : vector<8x32xbf16>, vector<8x32xbf16>, vector<8x8xf32> -> vector<8x8xf32>
    %c0_9 = arith.constant 0 : index
    %c0_10 = arith.constant 0 : index
    %10 = vector.load %arg7[%c0_9, %c0_10] : memref<8x1xf32, #tpu.memory_space<vmem>>, vector<8x1xf32>
    %cst_11 = arith.constant dense<0xFF800000> : vector<8xf32>
    %11 = vector.multi_reduction <maximumf>, %9, %cst_11 [1] : vector<8x8xf32> to vector<8xf32>
    %12 = vector.shape_cast %11 : vector<8xf32> to vector<8x1xf32>
    %13 = arith.maximumf %10, %12 : vector<8x1xf32>
    %14 = arith.subf %10, %13 : vector<8x1xf32>
    %15 = math.exp %14 : vector<8x1xf32>
    %16 = vector.broadcast %13 : vector<8x1xf32> to vector<8x8xf32>
    %17 = arith.subf %9, %16 : vector<8x8xf32>
    %18 = math.exp %17 : vector<8x8xf32>
    %c0_12 = arith.constant 0 : index
    %c0_13 = arith.constant 0 : index
    %19 = vector.load %arg8[%c0_12, %c0_13] : memref<8x1xf32, #tpu.memory_space<vmem>>, vector<8x1xf32>
    %20 = arith.mulf %15, %19 : vector<8x1xf32>
    %cst_14 = arith.constant dense<0.000000e+00> : vector<8xf32>
    %21 = vector.multi_reduction <add>, %18, %cst_14 [1] : vector<8x8xf32> to vector<8xf32>
    %22 = vector.shape_cast %21 : vector<8xf32> to vector<8x1xf32>
    %23 = arith.addf %20, %22 : vector<8x1xf32>
    %c0_15 = arith.constant 0 : index
    %c0_16 = arith.constant 0 : index
    %24 = vector.load %arg8[%c0_15, %c0_16] : memref<8x1xf32, #tpu.memory_space<vmem>>, vector<8x1xf32>
    tpu.vector_store %arg8[%c0_15, %c0_16], %23 {strides = array<i32>} : memref<8x1xf32, #tpu.memory_space<vmem>>, vector<8x1xf32>,
    %c0_17 = arith.constant 0 : index
    %c0_18 = arith.constant 0 : index
    %25 = vector.load %arg9[%c0_17, %c0_18] : memref<8x32xf32, #tpu.memory_space<vmem>>, vector<8x32xf32>
    %26 = vector.broadcast %15 : vector<8x1xf32> to vector<8x32xf32>
    %27 = arith.mulf %26, %25 : vector<8x32xf32>
    %28 = arith.truncf %18 : vector<8x8xf32> to vector<8x8xbf16>
    %cst_19 = arith.constant dense<0.000000e+00> : vector<8x32xf32>
    %29 = tpu.matmul %28, %8, %cst_19 {dimension_numbers = #tpu.dot_dimension_numbers<[1], [0], [0], [1], [0, 0, 1, 1], [], []>} : vector<8x8xbf16>, vector<8x32xbf16>, vector<8x32xf32> -> vector<8x32xf32>
    %30 = arith.addf %27, %29 : vector<8x32xf32>
    %c0_20 = arith.constant 0 : index
    %c0_21 = arith.constant 0 : index
    %31 = vector.load %arg9[%c0_20, %c0_21] : memref<8x32xf32, #tpu.memory_space<vmem>>, vector<8x32xf32>
    tpu.vector_store %arg9[%c0_20, %c0_21], %30 {strides = array<i32>} : memref<8x32xf32, #tpu.memory_space<vmem>>, vector<8x32xf32>,
    %c0_22 = arith.constant 0 : index
    %c0_23 = arith.constant 0 : index
    %32 = vector.load %arg7[%c0_22, %c0_23] : memref<8x1xf32, #tpu.memory_space<vmem>>, vector<8x1xf32>
    tpu.vector_store %arg7[%c0_22, %c0_23], %13 {strides = array<i32>} : memref<8x1xf32, #tpu.memory_space<vmem>>, vector<8x1xf32>,
    %c0_i32_24 = arith.constant 0 : i32
    %33 = arith.cmpi eq, %arg2, %c0_i32_24 : i32
    %34 = arith.extui %33 : i1 to i32
    %c0_i32_25 = arith.constant 0 : i32
    %35 = arith.cmpi ne, %34, %c0_i32_25 : i32
    scf.if %35 {
      %c0_26 = arith.constant 0 : index
      %c0_27 = arith.constant 0 : index
      %36 = vector.load %arg9[%c0_26, %c0_27] : memref<8x32xf32, #tpu.memory_space<vmem>>, vector<8x32xf32>
      %c0_28 = arith.constant 0 : index
      %c0_29 = arith.constant 0 : index
      %37 = vector.load %arg8[%c0_28, %c0_29] : memref<8x1xf32, #tpu.memory_space<vmem>>, vector<8x1xf32>
      %38 = vector.broadcast %37 : vector<8x1xf32> to vector<8x32xf32>
      %39 = arith.divf %36, %38 : vector<8x32xf32>
      %c0_30 = arith.constant 0 : index
      %c0_31 = arith.constant 0 : index
      %c0_32 = arith.constant 0 : index
      %40 = vector.load %arg6[%c0_30, %c0_31, %c0_32] : memref<1x8x32xf32, #tpu.memory_space<vmem>>, vector<1x8x32xf32>
      %41 = vector.shape_cast %40 : vector<1x8x32xf32> to vector<8x32xf32>
      %42 = vector.shape_cast %39 : vector<8x32xf32> to vector<1x8x32xf32>
      tpu.vector_store %arg6[%c0_30, %c0_31, %c0_32], %42 {strides = array<i32>} : memref<1x8x32xf32, #tpu.memory_space<vmem>>, vector<1x8x32xf32>,
    } else {
    }
    return
  }
  func.func @transform_0(%arg0: i32, %arg1: i32, %arg2: i32) -> (i32, i32, i32) {
    %c0_i32 = arith.constant 0 : i32
    %c0_i32_0 = arith.constant 0 : i32
    return %arg0, %arg1, %c0_i32 : i32, i32, i32
  }
  func.func @transform_1(%arg0: i32, %arg1: i32, %arg2: i32) -> (i32, i32, i32) {
    %c0_i32 = arith.constant 0 : i32
    %c0_i32_0 = arith.constant 0 : i32
    return %arg0, %arg2, %c0_i32 : i32, i32, i32
  }
  func.func @transform_2(%arg0: i32, %arg1: i32, %arg2: i32) -> (i32, i32, i32) {
    %c0_i32 = arith.constant 0 : i32
    %c0_i32_0 = arith.constant 0 : i32
    return %arg0, %arg2, %c0_i32 : i32, i32, i32
  }
  func.func @transform_3(%arg0: i32, %arg1: i32, %arg2: i32) -> (i32, i32, i32) {
    %c0_i32 = arith.constant 0 : i32
    %c0_i32_0 = arith.constant 0 : i32
    return %arg0, %arg1, %c0_i32 : i32, i32, i32
  }
}

</mosaic_0001>

<bundles_post_ra>
// kernel: self_att_v2.2
= control target key start
LH: loop header
LB: loop body
LE: loop exit
PB: predicated region body
PF: predicated region fallthrough
CT: control target
= control target key end

     0   :  { %s919_s30 = smov 0   ;;  %s921_s10 = smov 0   ;;  %s997_s0 = inlined_call_operand.vmem [shape: bf16[2,8,32], index: 0, kind: input, shape index: {}]   ;;  %s998_s1 = inlined_call_operand.vmem [shape: bf16[32,32], index: 1, kind: input, shape index: {}]   ;;  %s999_s2 = inlined_call_operand.vmem [shape: bf16[32,32], index: 2, kind: input, shape index: {}]   ;;  %s1000_s3 = inlined_call_operand.vmem [shape: bf16[32,32], index: 3, kind: input, shape index: {}]   ;;  %s1001_s4 = inlined_call_operand.vmem [shape: f32[1,32], index: 4, kind: input, shape index: {}]   ;;  %s1002_s5 = inlined_call_operand.vmem [shape: f32[1,32], index: 5, kind: input, shape index: {}]   ;;  %s1003_s6 = inlined_call_operand.vmem [shape: f32[1,32], index: 6, kind: input, shape index: {}]   ;;  %s1004_s7 = inlined_call_operand.vmem [shape: bf16[2,8,32], index: 7, kind: output, shape index: {0}]   ;;  %s1005_s8 = inlined_call_operand.vmem [shape: bf16[2,8,32], index: 8, kind: output, shape index: {1}]   ;;  %s1006_s9 = inlined_call_operand.vmem [shape: bf16[2,8,32], index: 9, kind: output, shape index: {2}]  }
   0x1   :  { %s923_s11 = smov 0  }
   0x2 LB: > { %s32_s12 = sadd.s32 1, %s861_s10  ;;  %p759_p0 = scmp.ge.s32.totalorder %s865_s11, 1  ;;  %s865_s11 = sphi %s923_s11, %s20_s11   ;;  %s861_s10 = sphi %s921_s10, %s1008_s10   ;;  %s857_s30 = sphi %s919_s30, %s1007_s30  }
   0x3   : > { %p34_p1 = scmp.ge.s32.totalorder %s32_s12, 2  ;;  %p314_p2 = scmp.lt.s32.totalorder %s865_s11, 3 }
   0x5   : > { %s1010_s12 = smov (%p34_p1, %s32_s12), 0  ;;  %p315_p3 = pnand %p759_p0, %p314_p2 }
   0x6   : > { %p368_p4 = scmp.lt.s32.totalorder (!%p315_p3), %s857_s30, 1 }
   0x7   : > { %318 = sbr.rel (%p315_p3) target bundleno = 228 (0xe4), region = 48 }
   0xc   : > { %v837_v0 = vld [vmem:[%s998_s1 + $0x8] sm:$0xff]   ;;  %v867_v1 = vmov 0.0   ;;  %v839_v3 = vld [vmem:[%s998_s1] sm:$0xff]   ;;  %vm868_vm0 = vmmov 0   ;;  %s1012_s30 = smov (!%p368_p4, %s857_s30), 1  ;;  %vm421_vm1 = vcmask 261120  }
   0xd   : > { %787 = vmatprep.subr.bf16.mxu0 %v867_v1  ;;  %795 = vmatprep.subr.bf16.mxu1 %v867_v1  ;;  %v838_v2 = vld [vmem:[%s999_s2 + $0x8] sm:$0xff]   ;;  %v840_v4 = vld [vmem:[%s999_s2] sm:$0xff]   ;;  %s951_s21 = sshll.u32 %s1012_s30, 2  ;;  %vm593_vm2 = vcmask 257024  }
   0xe   : > { %788 = vmatpush3.bf16.msra.mxu0 %v837_v0  ;;  %791 = vmatprep.mubr.msk.bf16.mxu0 %vm868_vm0, %v867_v1  ;;  %v841_v5 = vld [vmem:[%s1000_s3 + $0x8] sm:$0xff]   ;;  %s374_s26 = scalar_lea.vmem %s997_s0, %s951_s21  ;;  %v842_v7 = vld [vmem:[%s1000_s3] sm:$0xff]   ;;  %s388_s17 = scalar_lea.vmem %s1005_s8, %s951_s21 }
   0xf   : > { %789 = vmatprep.subr.bf16.mxu0 %v867_v1  ;;  %796 = vmatpush3.bf16.msra.mxu1 %v838_v2  ;;  %v397_v6 = vld [vmem:[%s374_s26] sm:$0xf]  ;;  %s381_s20 = scalar_lea.vmem %s1004_s7, %s951_s21  ;;  %s395_s26 = scalar_lea.vmem %s1006_s9, %s951_s21 }
  0x10   : > { %797 = vmatprep.subr.bf16.mxu1 %v867_v1  ;;  %799 = vmatprep.mubr.msk.bf16.mxu1 %vm868_vm0, %v867_v1  ;;  %v764_v8 = vld [vmem:[%s1001_s4] ss:$0 sm:$0xff] }
  0x11   : > { %v768_v9 = vld [vmem:[%s1002_s5] ss:$0 sm:$0xff] }
  0x12   : > { %790 = vmatpush3.bf16.msra.mxu0 %v839_v3  ;;  %v772_v22 = vld [vmem:[%s1003_s6] ss:$0 sm:$0xff] }
  0x13   : > { %798 = vmatpush3.bf16.msra.mxu1 %v840_v4  ;;  %803 = vmatprep.subr.bf16.mxu0 %v867_v1 }
  0x15   : > { %792 = vmatmul.mubr.msk.bf16.vlgmr.msra.gmra.mxu0 %vm421_vm1, %v397_v6 }
  0x16   : > { %804 = vmatpush3.bf16.msra.mxu0 %v841_v5  ;;  %800 = vmatmul.mubr.msk.bf16.vlgmr.msra.gmra.mxu1 %vm421_vm1, %v397_v6 }
  0x17   : > { %805 = vmatprep.subr.bf16.mxu0 %v867_v1  ;;  %807 = vmatprep.mubr.msk.bf16.mxu0 %vm868_vm0, %v867_v1 }
  0x1a   : > { %806 = vmatpush3.bf16.msra.mxu0 %v842_v7 }
  0x1d   : > { %808 = vmatmul.mubr.msk.bf16.vlgmr.msra.gmra.mxu0 %vm421_vm1, %v397_v6 }
  0xd5   : > { %v459_v10 = vpop.f32.mrf.mxu0 }
  0xd6   : > { %v460_v11 = vadd.f32 %v764_v8, %v459_v10  ;;  %v522_v12 = vpop.f32.mrf.mxu1 }
  0xd7   : > { %v793_v13 = vpop.f32.mrf.mxu0  ;;  %v523_v14 = vadd.f32 %v768_v9, %v522_v12 }
  0xd8   : > { %v591_v15 = vmul.f32 0.17677669, %v460_v11  ;;  %v801_v16 = vpop.f32.mrf.mxu1 }
  0xd9   : > { %v595_v17 = vpack.c.bf16 %v523_v14, %v523_v14  ;;  %v462_v18 = vpop.f32.mrf.mxu0 }
  0xda   : > { %v592_v19 = vpack.c.bf16 %v591_v15, %v591_v15  ;;  %v525_v20 = vpop.f32.mrf.mxu1 }
  0xdb   : > { %596 = vst.msk [vmem:[%s388_s17] sm:$0xf] %vm593_vm2, %v595_v17  ;;  %v794_v21 = vpop.f32.mrf.mxu0 }
  0xdc   : > { %594 = vst.msk [vmem:[%s381_s20] sm:$0xf] %vm593_vm2, %v592_v19  ;;  %v802_v23 = vpop.f32.mrf.mxu1 }
  0xdd   : > { %v585_v24 = vpop.f32.mrf.mxu0 }
  0xde   : > { %v586_v25 = vadd.f32 %v772_v22, %v585_v24 }
  0xdf   : > { %v809_v26 = vpop.f32.mrf.mxu0 }
  0xe0   : > { %v597_v27 = vpack.c.bf16 %v586_v25, %v586_v25 }
  0xe1   : > { %v588_v28 = vpop.f32.mrf.mxu0 }
  0xe2   : > { %598 = vst.msk [vmem:[%s395_s26] sm:$0xf] %vm593_vm2, %v597_v27 }
  0xe3   : > { %v810_v29 = vpop.f32.mrf.mxu0 }
  0xe4 PF: > { %s20_s11 = sadd.s32 1, %s865_s11   ;;  %s1007_s30 = smov %s861_s10 }
  0xe5   : > { %p17_p5 = scmp.ge.s32.totalorder %s20_s11, 4   ;;  %s1008_s10 = smov %s1010_s12 }
  0xe7   :  { %19 = sbr.rel (!%p17_p5) target bundleno = 2 (0x2), region = 102 }

// kernel: self_att_v2.3
= control target key start
LH: loop header
LB: loop body
LE: loop exit
PB: predicated region body
PF: predicated region fallthrough
CT: control target
= control target key end

     0   :  { %8 = vsyncpa [#allocation6], 0  ;;  %s852_s0 = inlined_call_operand.vmem [shape: bf16[2,8,32], index: 0, kind: input, shape index: {}]   ;;  %s853_s1 = inlined_call_operand.vmem [shape: bf16[2,8,32], index: 1, kind: input, shape index: {}]   ;;  %s854_s2 = inlined_call_operand.vmem [shape: bf16[2,8,32], index: 2, kind: input, shape index: {}]   ;;  %s855_s3 = inlined_call_operand.hbm [shape: f32[2,8,32], index: 3, kind: output, shape index: {}]  }
   0x1   :  { %10 = vsyncpa [#allocation6 + $0x1], 0  ;;  %s730_s12 = smov 0   ;;  %s732_s13 = smov 0  }
   0x2   :  { %s734_s14 = smov 0   ;;  %s736_s15 = smov 0  }
   0x3   :  { %s738_s16 = smov 0   ;;  %s740_s17 = smov 0  }
   0x4 LB: > { %s529_s18 = sadd.s32 4294967295, %s703_s17   ;;  %s530_s19 = sadd.s32 4294967294, %s703_s17   ;;  %s703_s17 = sphi %s740_s17, %s16_s17   ;;  %s699_s16 = sphi %s738_s16, %s862_s16   ;;  %s695_s15 = sphi %s736_s15, %s861_s15   ;;  %s691_s14 = sphi %s734_s14, %s860_s14   ;;  %s687_s13 = sphi %s732_s13, %s859_s13   ;;  %s683_s12 = sphi %s730_s12, %s858_s12  }
   0x5   : > { %s35_s20 = sadd.s32 1, %s699_s16  ;;  %s128_s21 = sadd.s32 1, %s691_s14 }
   0x6   : > { %p37_p0 = scmp.ge.s32.totalorder %s35_s20, 2  ;;  %p138_p1 = scmp.ne.s32.totalorder %s691_s14, %s687_s13 }
   0x7   : > { %p139_p2 = scmp.eq.s32.totalorder %s529_s18, 1  ;;  %p144_p3 = scmp.ne.s32.totalorder %s687_s13, %s683_s12 }
   0x8   : > { %s864_s20 = smov (%p37_p0, %s35_s20), 0  ;;  %p145_p5 = scmp.eq.s32.totalorder %s530_s19, 1 }
   0x9   : > { %p770_p4 = por %p139_p2, %p138_p1  ;;  %s123_s23 = ssub.s32 %s699_s16, %s864_s20 }
   0xa   : > { %p533_p6 = scmp.ge.s32.totalorder %s703_s17, 1  ;;  %p126_p7 = scmp.eq.s32.totalorder %s123_s23, 0 }
   0xb   : > { %p777_p8 = por %p145_p5, %p144_p3  ;;  %p193_p9 = scmp.lt.s32.totalorder %s703_s17, 3 }
   0xc   : > { %s783_s25 = scalar_select %p126_p7, %s691_s14, %s128_s21  }
   0xd   : > { %p194_p10 = pnand %p533_p6, %p193_p9 }
   0xe   : > { %p233_p11 = scmp.lt.s32.totalorder (!%p194_p10), %s695_s15, 1  ;;  %s230_s10 = sand.u32 (!%p194_p10), 1, %s687_s13  }
   0xf   : > { %197 = sbr.rel (%p194_p10) target bundleno = 813 (0x32d), region = 32  ;;  %s534_s11 = sshll.u32 (!%p194_p10), %s230_s10, 3 }
  0x10   : > { %s541_s18 = sshll.u32 (!%p194_p10), %s695_s15, 7  ;;  %s232_s19 = scalar_lea.vmem (!%p194_p10), [#allocation5], %s534_s11 }
  0x11   : > { %s425_s21 = sshll.u32 (!%p194_p10), %s232_s19, 4  ;;  %s411_s28 = scalar_lea.sflag (!%p194_p10), [#allocation6], %s230_s10  ;;  %s426_s21 = int_to_ptr.vmem [resolvable:$true] %s425_s21 }
  0x12   : > { %s627_s29 = scalar_lea.vmem (!%p194_p10), %s426_s21, 128 }
  0x13   : > { %p628_p12 = scmp.ne.s32.totalorder (!%p194_p10), %s426_s21, %s627_s29 }
  0x14   : > { %vm262_vm0 = vcmask 261120   ;;  %v705_v0 = vmov 0.0   ;;  %vm706_vm1 = vmmov 0   ;;  %s234_s26 = scalar_select %p233_p11, %s695_s15, 1  ;;  %vm259_vm2 = vcmask 7168  }
  0x15   : > { %548 = vmatprep.subr.bf16.mxu0 %v705_v0  ;;  %263 = vst.msk [vmem:[#allocation4] sm:$0xff] %vm262_vm0, %v705_v0  ;;  %550 = vmatprep.mubr.msk.bf16.mxu0 %vm706_vm1, %v705_v0  ;;  %v707_v4 = vmov -inf   ;;  %vm315_vm3 = vcmask 64512   ;;  %v708_v10 = vmov 0   ;;  %vm350_vm4 = vcmask 1043456   ;;  %p629_p13 = pnand %p628_p12, %p770_p4 }
  0x16   : > { %554 = vmatprep.subr.bf16.mxu1 %v705_v0  ;;  %556 = vmatprep.mubr.msk.bf16.mxu1 %vm706_vm1, %v705_v0  ;;  %s788_s27 = sshll.u32 %s234_s26, 2  ;;  %260 = vst.msk [vmem:[#allocation2] sm:$0xff] %vm259_vm2, %v707_v4  ;;  %261 = vst.msk [vmem:[#allocation3] sm:$0xff] %vm259_vm2, %v705_v0 }
  0x17   : > { %s246_s30 = scalar_lea.vmem %s853_s1, %s788_s27  ;;  %s239_s6 = scalar_lea.vmem %s852_s0, %s788_s27  ;;  %619 = vset.pattern.permute.xlu0 %v708_v10  ;;  %620 = vset.pattern.permute.xlu1 %v708_v10 }
  0x18   : > { %v265_v1 = vld [vmem:[%s246_s30] sm:$0xf]  ;;  %s253_s9 = scalar_lea.vmem %s854_s2, %s788_s27  ;;  %s423_s27 = scalar_lea.hbm %s855_s3, %s541_s18 }
  0x19   : > { %v272_v2 = vsel %vm262_vm0, %v265_v1, 0  ;;  %v264_v3 = vld [vmem:[%s239_s6] sm:$0xf]  ;;  %p630_p0 = pneg %p629_p13  ;;  %s709_s30 = smov [#allocation5]  }
  0x1a   : > { %549 = vmatpush3.bf16.xpose.msra.mxu0 %v272_v2  ;;  %v266_v15 = vld [vmem:[%s253_s9] sm:$0xf]  ;;  %s631_s15 = sshll.u32 %s709_s30, 4  ;;  %s632_s15 = int_to_ptr.vmem [resolvable:$false] %s631_s15 }
  0x1b   : > { %v352_v16 = vsel %vm350_vm4, %v266_v15, 0  ;;  %s633_s4 = scalar_lea.vmem %s632_s15, 256  ;;  %p634_p1 = scmp.lt.s32.totalorder %s426_s21, %s632_s15 }
  0x1c   : > { %555 = vmatpush3.bf16.msra.mxu1 %v352_v16  ;;  %v339_v35 = vld [vmem:[#allocation4] sm:$0xff]  ;;  %p635_p2 = scmp.lt.s32.totalorder %s633_s4, %s627_s29 }
  0x1d   : > { %v314_v11 = vld [vmem:[#allocation2] sm:$0xff]  ;;  %v331_v25 = vld [vmem:[#allocation3] sm:$0xff] }
  0x1e   : > { %p636_p3 = por %p635_p2, %p634_p1 }
  0x20   : > { %p637_p5 = pnand %p636_p3, %p630_p0 }
  0x21   : > { %551 = vmatmul.mubr.msk.bf16.vlgmr.msra.gmra.mxu0 %vm262_vm0, %v264_v3 }
  0xe1   : > { %v308_v5 = vpop.f32.mrf.mxu0 }
  0xe2   : > { %v316_v6 = vsel %vm315_vm3, %v308_v5, -inf }
  0xe3   : > { %317 = vmax.xlane.f32.xlu0 %v316_v6  ;;  %v552_v7 = vpop.f32.mrf.mxu0 }
  0xe5   : > { %v311_v8 = vpop.f32.mrf.mxu0 }
  0xe7   : > { %v553_v9 = vpop.f32.mrf.mxu0 }
 0x16c   : > { %v318_v12 = vpop.xlane.xlu0 %317 }
 0x16d   : > { %v319_v13 = vmax.f32 %v314_v11, %v318_v12 }
 0x16f   : > { %v320_v14 = vsub.f32 %v314_v11, %v319_v13  ;;  %396 = vst.msk [vmem:[#allocation2] sm:$0xff] %vm259_vm2, %v319_v13  ;;  %325 = vperm.xlu0 %619, %v319_v13  }
 0x171   : > { %v321_v23 = vmul.f32 1.442695, %v320_v14 }
 0x1ea   : > { %v326_v17 = vpop.permute.xlu0 %325 }
 0x1eb   : > { %v328_v18 = vsub.f32 %v308_v5, %v326_v17 }
 0x1ed   : > { %v329_v19 = vmul.f32 1.442695, %v328_v18 }
 0x1ef   : > { %621 = vpow2.f32 %v329_v19 }
 0x1f0   : > { %623 = vpow2.f32 %v321_v23 }
 0x1fc   : > { %v622_v20 = vpop.eup %621 }
 0x1fd   : > { %v333_v21 = vsel %vm315_vm3, %v622_v20, 0.0  ;;  %v346_v22 = vpack.c.bf16 %v622_v20, %v622_v20  ;;  %v624_v24 = vpop.eup %623 }
 0x1fe   : > { %334 = vadd.xlane.f32.xlu1 %v333_v21  ;;  %v332_v26 = vmul.f32 %v624_v24, %v331_v25 }
 0x1ff   : > { %557 = vmatmul.mubr.msk.bf16.vlgmr.msra.gmra.mxu1 %vm315_vm3, %v346_v22 }
 0x287   : > { %v335_v27 = vpop.xlane.xlu1 %334 }
 0x288   : > { %v336_v28 = vadd.f32 %v335_v27, %v332_v26 }
 0x28a   : > { %338 = vst.msk [vmem:[#allocation3] sm:$0xff] %vm259_vm2, %v336_v28 }
 0x291   : > { %v401_v29 = vld [vmem:[#allocation3] sm:$0xff] }
 0x292   : > { %404 = vperm.xlu1 %620, %v401_v29  }
 0x296   : > { %342 = vperm.xlu1 %620, %v624_v24  }
 0x2bf   : > { %v388_v30 = vpop.f32.mrf.mxu1 }
 0x2c1   : > { %v558_v31 = vpop.f32.mrf.mxu1 }
 0x2c3   : > { %v391_v32 = vpop.f32.mrf.mxu1 }
 0x2c5   : > { %v559_v33 = vpop.f32.mrf.mxu1 }
 0x30d   : > { %v405_v34 = vpop.permute.xlu1 %404 }
 0x30e   : > { %625 = vrcp.f32 %v405_v34 }
 0x311   : > { %v343_v36 = vpop.permute.xlu1 %342 }
 0x312   : > { %v345_v37 = vmul.f32 %v343_v36, %v339_v35 }
 0x314   : > { %v394_v38 = vadd.f32 %v388_v30, %v345_v37 }
 0x316   : > { %395 = vst.msk [vmem:[#allocation4] sm:$0xff] %vm262_vm0, %v394_v38 }
 0x31b   : > { %v626_v39 = vpop.eup %625 }
 0x31d   : > { %v400_v40 = vld [vmem:[#allocation4] sm:$0xff] }
 0x31e   : > { %v408_v41 = vmul.f32 %v626_v39, %v400_v40 }
 0x320   : > { %409 = vst.msk [vmem:[%s232_s19] sm:$0xff] %vm262_vm0, %v408_v41 }
 0x321   : > { %640 = shalt.err (!%p637_p5)
}
 0x322   : > { %s641_s5 = scalar_lea.hbm %s423_s27, 128  ;;  %s645_s8 = scalar_lea.hbm %s855_s3, 256 }
 0x323   : > { %p642_p6 = scmp.ne.s32.totalorder %s423_s27, %s641_s5  ;;  %p646_p10 = scmp.lt.s32.totalorder %s423_s27, %s855_s3 }
 0x324   : > { %p647_p11 = scmp.lt.s32.totalorder %s645_s8, %s641_s5 }
 0x325   : > { %p643_p7 = pnand %p642_p6, %p770_p4 }
 0x326   : > { %p648_p12 = por %p647_p11, %p646_p10 }
 0x327   : > { %p644_p9 = pneg %p643_p7 }
 0x329   : > { %p649_p13 = pnand %p648_p12, %p644_p9 }
 0x32b   : > { %652 = shalt.err (!%p649_p13)
}
 0x32c   : > { %560 = dma.vmem_to_hbm [thread:$0]  (%p770_p4), %s426_s21, 128, %s423_s27, %s411_s28  }
 0x32d PF: > { %p566_p0 = scmp.ge.s32.totalorder %s703_s17, 2  ;;  %s437_s11 = sand.u32 1, %s683_s12  }
 0x32e   : > { %s438_s18 = scalar_lea.sflag [#allocation6], %s437_s11 }
 0x32f   : > { %p563_p1 = pnand %p566_p0, %p777_p8 }
 0x331   : > { %p564_p2 = pneg %p563_p1 }
 0x333   : > { %678 = dma.done.wait (%p564_p2), %s438_s18, 128  }
 0x334   : > { %680 = vsyncadd (%p564_p2), %s438_s18, 4294967168  ;;  %s16_s17 = sadd.s32 1, %s703_s17   ;;  %s858_s12 = smov %s687_s13 }
 0x335   : > { %p13_p3 = scmp.ge.s32.totalorder %s16_s17, 4   ;;  %s859_s13 = smov %s691_s14 }
 0x336   : > { %s860_s14 = smov %s783_s25  ;;  %s861_s15 = smov %s699_s16 }
 0x337   : > { %s862_s16 = smov %s864_s20  ;;  %15 = sbr.rel (!%p13_p3) target bundleno = 4 (0x4), region = 81 }
 0x33c   :  { %443 = vsyncpa [#allocation6], 1 }
 0x33d   :  { %445 = vsyncpa [#allocation6 + $0x1], 1 }

</bundles_post_ra>
